<compile_context>
chip_gen: v6e
topology: v6e:2x2x1
jax: 0.10.0
libtpu: 0.0.40
codegen_flags: <defaults>
</compile_context>

<pallas_src>
import jax
import jax.numpy as jnp
import numpy as np
from jax.experimental import pallas as pl
from jax.experimental.pallas import tpu as pltpu


def _round_up(x, m):
    return (x + m - 1) // m * m


def _embedder_kernel(idx_ref,      # VMEM: (tile_n, 1) int32 token -> row ids
                     fused_ref,    # VMEM: (vocab_tile, d_model) fused table block
                     b_ref,        # VMEM (resident): (1, d_model) bias
                     out_ref,      # VMEM: (tile_n, d_model) output tile
                     acc_ref):     # VMEM scratch: (tile_n, d_model) f32 accumulator
    v = pl.program_id(1)
    n_v = pl.num_programs(1)
    tile_n = acc_ref.shape[0]
    vocab_tile = fused_ref.shape[0]

    @pl.when(v == 0)
    def _():
        acc_ref[...] = jnp.zeros_like(acc_ref)

    # One-hot MXU gather over this vocab block: exactly one 1.0 per token row
    # (or none, if the id falls outside this block) -> exact row selection of
    # the fused table.  precision=HIGHEST keeps the f32 values un-demoted.
    idx = idx_ref[...]                                                   # (tile_n, 1)
    lane = jax.lax.broadcasted_iota(jnp.int32, (tile_n, vocab_tile), 1) + v * vocab_tile
    onehot = (lane == idx).astype(jnp.float32)                           # (tile_n, vocab_tile)
    acc_ref[...] += jnp.dot(onehot, fused_ref[...],
                            preferred_element_type=jnp.float32,
                            precision=jax.lax.Precision.HIGHEST)

    @pl.when(v == n_v - 1)
    def _():
        out_ref[...] = (acc_ref[...] + b_ref[...]).astype(out_ref.dtype)


def embedder_forward(src, table, weight, bias, *, tile_n=512,
                     out_dtype=jnp.float32,
                     vocab_block_budget_bytes=4 << 20):
    """src: (B, S) integer ids; table: (vocab, feat); weight: (d_model, feat);
    bias: (d_model,).  Returns (B, S, d_model) = table[src] @ W.T + b."""
    B, S = src.shape
    N = B * S
    vocab, feat = table.shape
    d_model = weight.shape[0]

    # --- One-off fuse in the wrapper: fused[i] = table[i] @ W.T  (vocab, d_model)
    fused = jnp.dot(table.astype(jnp.float32), weight.T.astype(jnp.float32))

    # --- Vocab padding / tiling: pad to a lane multiple (128); cap each streamed
    # block at ~vocab_block_budget_bytes so VMEM stays bounded even for big vocabs
    # (v7x has only 64 MiB physical VMEM).  Padded rows are zero and never selected.
    vocab_pad = _round_up(vocab, 128)
    row_bytes = d_model * 4
    max_rows = max(128, (vocab_block_budget_bytes // row_bytes) // 128 * 128)
    vocab_tile = min(vocab_pad, max_rows)
    vocab_pad = _round_up(vocab_pad, vocab_tile)
    if vocab_pad != vocab:
        fused = jnp.concatenate(
            [fused, jnp.zeros((vocab_pad - vocab, d_model), jnp.float32)], axis=0)

    # --- Token tiling: big tiles amortize per-grid-step overhead, but keep >= 2
    # steps whenever possible so v7x can shard the "parallel" axis across its
    # two TensorCores.
    n_rows = _round_up(max(N, 8), 8)
    tile = min(_round_up(tile_n, 8), n_rows)
    if tile >= n_rows and n_rows >= 16:
        tile = _round_up((n_rows + 1) // 2, 8)
    n_pad = _round_up(N, tile)

    idx_col = src.reshape(N, 1).astype(jnp.int32)
    if n_pad != N:
        # Padding rows use id 0; their output is sliced off below.
        idx_col = jnp.pad(idx_col, ((0, n_pad - N), (0, 0)))

    b_row = bias.reshape(1, d_model).astype(jnp.float32)

    grid = (n_pad // tile, vocab_pad // vocab_tile)

    out_flat = pl.pallas_call(
        _embedder_kernel,
        out_shape=jax.ShapeDtypeStruct((n_pad, d_model), out_dtype),
        grid=grid,
        in_specs=[
            pl.BlockSpec((tile, 1), lambda i, v: (i, 0)),              # token ids
            pl.BlockSpec((vocab_tile, d_model), lambda i, v: (v, 0)),  # fused table block
            pl.BlockSpec(memory_space=pltpu.MemorySpace.VMEM),         # bias, resident
        ],
        out_specs=pl.BlockSpec((tile, d_model), lambda i, v: (i, 0)),
        scratch_shapes=[pltpu.VMEM((tile, d_model), jnp.float32)],
        compiler_params=pltpu.CompilerParams(
            dimension_semantics=("parallel", "arbitrary")),
    )(idx_col, fused, b_row)

    return out_flat[:N].reshape(B, S, d_model)


if __name__ == "__main__":
    # Small synthetic shapes consistent with the module:
    #   feat_size (mat2vec feature dim) = 32, d_model = 128 (multiple of 128 ->
    #   lane-dense output stores, like real configs where d_model = 512),
    #   n_elements = 20 -> vocab = 21 (row 0 is the zero "padding" row),
    #   batch = 2, seq = 8.
    # TODO(synk): the real module loads mat2vec.csv from disk; a deterministic
    # synthetic table stands in for it here.
    feat_size = 32
    d_model = 128
    n_elements = 20
    vocab = n_elements + 1
    B, S = 2, 8

    key = jax.random.PRNGKey(0)
    k_cbfv, k_w, k_b, k_src = jax.random.split(key, 4)

    # Deterministic synthetic mat2vec table; prepend the zero row like the module.
    cbfv = jax.random.normal(k_cbfv, (n_elements, feat_size), dtype=jnp.float32)
    table = jnp.concatenate(
        [jnp.zeros((1, feat_size), dtype=jnp.float32), cbfv], axis=0)  # (vocab, feat)

    # nn.Linear(feat_size, d_model) parameters (deterministic init).
    lim = 1.0 / np.sqrt(feat_size)
    weight = jax.random.uniform(k_w, (d_model, feat_size),
                                minval=-lim, maxval=lim, dtype=jnp.float32)
    bias = jax.random.uniform(k_b, (d_model,),
                              minval=-lim, maxval=lim, dtype=jnp.float32)

    # Integer element indices (0 = padding row), shape (B, S).
    src = jax.random.randint(k_src, (B, S), minval=0, maxval=vocab, dtype=jnp.int32)

    out = embedder_forward(src, table, weight, bias)
    out = jax.block_until_ready(out)

    # Pure-JAX reference: Embedding lookup followed by Linear.
    ref = jnp.take(table, src.reshape(-1), axis=0) @ weight.T + bias
    ref = ref.reshape(B, S, d_model)

    assert out.shape == (B, S, d_model)
    np.testing.assert_allclose(np.asarray(out), np.asarray(ref), rtol=1e-5, atol=1e-5)
    print("KERNEL_OK")
</pallas_src>

<mosaic_0001>
module attributes {stable_mosaic.version = 11 : i64} {
  func.func @_embedder_kernel(%arg0: i32, %arg1: i32, %arg2: memref<8x1xi32, #tpu.memory_space<vmem>>, %arg3: memref<128x128xf32, #tpu.memory_space<vmem>>, %arg4: memref<1x128xf32, #tpu.memory_space<vmem>>, %arg5: memref<8x128xf32, #tpu.memory_space<vmem>>, %arg6: memref<8x128xf32, #tpu.memory_space<vmem>>) attributes {dimension_semantics = [#tpu.dimension_semantics<parallel>, #tpu.dimension_semantics<arbitrary>], iteration_bounds = array<i64: 2, 1>, scalar_prefetch = 0 : i64, scratch_operands = 1 : i64, tpu.core_type = #tpu.core_type<tc>, window_params = [{transform_indices = @transform_0, window_bounds = array<i64: 8, 1>}, {transform_indices = @transform_1, window_bounds = array<i64: 128, 128>}, {pipeline_mode = #tpu.pipeline_mode<synchronous>, transform_indices = @transform_2, window_bounds = array<i64: 1, 128>}, {transform_indices = @transform_3, window_bounds = array<i64: 8, 128>}]} {
    %c0_i32 = arith.constant 0 : i32
    %0 = arith.cmpi eq, %arg1, %c0_i32 : i32
    %1 = arith.extui %0 : i1 to i32
    %c0_i32_0 = arith.constant 0 : i32
    %2 = arith.cmpi ne, %1, %c0_i32_0 : i32
    scf.if %2 {
      %cst_10 = arith.constant 0.000000e+00 : f32
      %20 = vector.broadcast %cst_10 : f32 to vector<8x128xf32>
      %c0_11 = arith.constant 0 : index
      %c0_12 = arith.constant 0 : index
      %21 = vector.load %arg6[%c0_11, %c0_12] : memref<8x128xf32, #tpu.memory_space<vmem>>, vector<8x128xf32>
      tpu.vector_store %arg6[%c0_11, %c0_12], %20 {strides = array<i32>} : memref<8x128xf32, #tpu.memory_space<vmem>>, vector<8x128xf32>,
    } else {
    }
    %c0 = arith.constant 0 : index
    %c0_1 = arith.constant 0 : index
    %3 = vector.load %arg2[%c0, %c0_1] : memref<8x1xi32, #tpu.memory_space<vmem>>, vector<8x1xi32>
    %4 = tpu.iota {dimensions = array<i32: 1>} : vector<8x128xi32>
    %c128_i32 = arith.constant 128 : i32
    %5 = arith.muli %arg1, %c128_i32 : i32
    %6 = vector.broadcast %5 : i32 to vector<8x128xi32>
    %7 = arith.addi %4, %6 : vector<8x128xi32>
    %8 = vector.broadcast %3 : vector<8x1xi32> to vector<8x128xi32>
    %9 = arith.cmpi eq, %7, %8 : vector<8x128xi32>
    %10 = arith.extui %9 : vector<8x128xi1> to vector<8x128xi32>
    %11 = arith.sitofp %10 : vector<8x128xi32> to vector<8x128xf32>
    %c0_2 = arith.constant 0 : index
    %c0_3 = arith.constant 0 : index
    %12 = vector.load %arg6[%c0_2, %c0_3] : memref<8x128xf32, #tpu.memory_space<vmem>>, vector<8x128xf32>
    %c0_4 = arith.constant 0 : index
    %c0_5 = arith.constant 0 : index
    %13 = vector.load %arg3[%c0_4, %c0_5] : memref<128x128xf32, #tpu.memory_space<vmem>>, vector<128x128xf32>
    %cst = arith.constant dense<0.000000e+00> : vector<8x128xf32>
    %14 = tpu.matmul %11, %13, %cst {dimension_numbers = #tpu.dot_dimension_numbers<[1], [0], [0], [1], [0, 0, 1, 1], [], []>, precision = #tpu.contract_precision<fp32>} : vector<8x128xf32>, vector<128x128xf32>, vector<8x128xf32> -> vector<8x128xf32>
    %15 = arith.addf %12, %14 : vector<8x128xf32>
    %c0_6 = arith.constant 0 : index
    %c0_7 = arith.constant 0 : index
    %16 = vector.load %arg6[%c0_6, %c0_7] : memref<8x128xf32, #tpu.memory_space<vmem>>, vector<8x128xf32>
    tpu.vector_store %arg6[%c0_6, %c0_7], %15 {strides = array<i32>} : memref<8x128xf32, #tpu.memory_space<vmem>>, vector<8x128xf32>,
    %c0_i32_8 = arith.constant 0 : i32
    %17 = arith.cmpi eq, %arg1, %c0_i32_8 : i32
    %18 = arith.extui %17 : i1 to i32
    %c0_i32_9 = arith.constant 0 : i32
    %19 = arith.cmpi ne, %18, %c0_i32_9 : i32
    scf.if %19 {
      %c0_10 = arith.constant 0 : index
      %c0_11 = arith.constant 0 : index
      %20 = vector.load %arg6[%c0_10, %c0_11] : memref<8x128xf32, #tpu.memory_space<vmem>>, vector<8x128xf32>
      %c0_12 = arith.constant 0 : index
      %c0_13 = arith.constant 0 : index
      %21 = vector.load %arg4[%c0_12, %c0_13] : memref<1x128xf32, #tpu.memory_space<vmem>>, vector<1x128xf32>
      %22 = vector.broadcast %21 : vector<1x128xf32> to vector<8x128xf32>
      %23 = arith.addf %20, %22 : vector<8x128xf32>
      %c0_14 = arith.constant 0 : index
      %c0_15 = arith.constant 0 : index
      %24 = vector.load %arg5[%c0_14, %c0_15] : memref<8x128xf32, #tpu.memory_space<vmem>>, vector<8x128xf32>
      tpu.vector_store %arg5[%c0_14, %c0_15], %23 {strides = array<i32>} : memref<8x128xf32, #tpu.memory_space<vmem>>, vector<8x128xf32>,
    } else {
    }
    return
  }
  func.func @transform_0(%arg0: i32, %arg1: i32) -> (i32, i32) {
    %c0_i32 = arith.constant 0 : i32
    %c0_i32_0 = arith.constant 0 : i32
    return %arg0, %c0_i32 : i32, i32
  }
  func.func @transform_1(%arg0: i32, %arg1: i32) -> (i32, i32) {
    %c0_i32 = arith.constant 0 : i32
    %c0_i32_0 = arith.constant 0 : i32
    return %arg1, %c0_i32 : i32, i32
  }
  func.func @transform_2(%arg0: i32, %arg1: i32) -> (i32, i32) {
    %c0_i32 = arith.constant 0 : i32
    %c0_i32_0 = arith.constant 0 : i32
    %c0_i32_1 = arith.constant 0 : i32
    return %c0_i32, %c0_i32_0 : i32, i32
  }
  func.func @transform_3(%arg0: i32, %arg1: i32) -> (i32, i32) {
    %c0_i32 = arith.constant 0 : i32
    %c0_i32_0 = arith.constant 0 : i32
    return %arg0, %c0_i32 : i32, i32
  }
}

</mosaic_0001>

<bundles_post_ra>
// kernel: tpu_custom_call.1
= control target key start
LH: loop header
LB: loop body
LE: loop exit
PB: predicated region body
PF: predicated region fallthrough
CT: control target
= control target key end

     0   :  { %8 = vsyncpa [#allocation4], 0  ;;  %s2024_s0 = inlined_call_operand.vmem [shape: s32[16,1], index: 0, kind: input, shape index: {}]   ;;  %s2025_s1 = inlined_call_operand.hbm [shape: f32[128,128], index: 1, kind: input, shape index: {}]   ;;  %s2026_s2 = inlined_call_operand.vmem [shape: f32[1,128], index: 2, kind: input, shape index: {}]   ;;  %s2027_s3 = inlined_call_operand.hbm [shape: f32[16,128], index: 3, kind: output, shape index: {}]  }
   0x1   :  { %9 = vsyncpa [#allocation5], 0 }
   0x2   :  { %11 = vsyncpa [#allocation5 + $0x1], 0  ;;  %s1526_s12 = smov 0   ;;  %s1528_s13 = smov 0  }
   0x3   :  { %s1530_s14 = smov 0   ;;  %s1532_s15 = smov 0  }
   0x4   :  { %s1534_s16 = smov 0   ;;  %s1536_s17 = smov 0  }
   0x5 LB: > { %s987_s18 = sadd.s32 4294967295, %s1496_s17   ;;  %s988_s19 = sadd.s32 4294967294, %s1496_s17   ;;  %s1496_s17 = sphi %s1536_s17, %s17_s17   ;;  %s1492_s16 = sphi %s1534_s16, %s2036_s16   ;;  %s1488_s15 = sphi %s1532_s15, %s2035_s15   ;;  %s1484_s14 = sphi %s1530_s14, %s2034_s14   ;;  %s1480_s13 = sphi %s1528_s13, %s2033_s13   ;;  %s1476_s12 = sphi %s1526_s12, %s2032_s12  }
   0x6   : > { %s29_s20 = sadd.s32 1, %s1492_s16  ;;  %s109_s21 = sadd.s32 1, %s1484_s14 }
   0x7   : > { %p31_p0 = scmp.ge.s32.totalorder %s29_s20, 2  ;;  %p119_p1 = scmp.ne.s32.totalorder %s1484_s14, %s1480_s13 }
   0x8   : > { %p120_p2 = scmp.eq.s32.totalorder %s987_s18, 1  ;;  %p125_p3 = scmp.ne.s32.totalorder %s1480_s13, %s1476_s12 }
   0x9   : > { %s2038_s20 = smov (%p31_p0, %s29_s20), 0  ;;  %p126_p5 = scmp.eq.s32.totalorder %s988_s19, 1 }
   0xa   : > { %p1566_p4 = por %p120_p2, %p119_p1  ;;  %s106_s23 = ssub.s32 %s1492_s16, %s2038_s20 }
   0xb   : > { %p989_p6 = scmp.ge.s32.totalorder %s1496_s17, 1  ;;  %p107_p7 = scmp.eq.s32.totalorder %s106_s23, 0 }
   0xc   : > { %p1573_p8 = por %p126_p5, %p125_p3  ;;  %p133_p9 = scmp.lt.s32.totalorder %s1496_s17, 3 }
   0xd   : > { %s1579_s25 = scalar_select %p107_p7, %s1484_s14, %s109_s21  }
   0xe   : > { %p1581_p10 = pnand %p989_p6, %p133_p9  ;;  %p1585_p11 = scmp.eq.s32.totalorder %s987_s18, 0 }
   0xf   : > { %s1498_s28 = smov [#allocation3]  }
  0x10   : > { %p1323_p12 = pneg %p1581_p10  ;;  %s148_s29 = sshll.u32 %s1498_s28, 4  ;;  %s149_s29 = int_to_ptr.vmem [resolvable:$true] %s148_s29 }
  0x11   : > { %s1401_s30 = scalar_lea.vmem %s149_s29, 2048  ;;  %p1409_p5 = scmp.lt.s32.totalorder %s149_s29, %s149_s29 }
  0x12   : > { %p1324_p13 = pnand %p1585_p11, %p1323_p12  ;;  %p1402_p1 = scmp.ne.s32.totalorder %s149_s29, %s1401_s30 }
  0x13   : > { %p1410_p6 = scmp.lt.s32.totalorder %s1401_s30, %s1401_s30 }
  0x14   : > { %p1392_p0 = pneg %p1324_p13 }
  0x15   : > { %p1411_p7 = por %p1410_p6, %p1409_p5 }
  0x16   : > { %p1404_p2 = pnand %p1402_p1, %p1392_p0 }
  0x18   : > { %p1405_p3 = pneg %p1404_p2 }
  0x1a   : > { %p1412_p9 = pnand %p1411_p7, %p1405_p3 }
  0x1c   : > { %1415 = shalt.err (!%p1412_p9)
}
  0x1d   : > { %s1499_s4 = smov 128   ;;  %s1500_s5 = smov 8  }
  0x1e   : > { %1326 = dma.hbm_to_vmem [thread:$0]  (!%p1324_p13), %s2025_s1, 2048, %s149_s29, [#allocation4], %s1499_s4, %s1499_s4, %s1500_s5  }
  0x1f   : > { %174 = sbr.rel (%p1581_p10) target bundleno = 456 (0x1c8), region = 32 }
  0x24   : > { %1467 = dma.done.wait (%p1585_p11), [#allocation4], 2048  }
  0x25   : > { %1469 = vsyncadd (%p1585_p11), [#allocation4], 4294965248  ;;  %p197_p12 = scmp.lt.s32.totalorder %s1488_s15, 1  ;;  %v1501_v0 = vmov 0   ;;  %v1502_v1 = vmov 0.0   ;;  %vm1503_vm0 = vmmov 0  }
  0x26   : > { %1389 = vset.pattern.permute.xlu0 %v1501_v0  ;;  %1142 = vmatprep.subr.mxu1 %v1502_v1  ;;  %v235_v3 = vld [vmem:[#allocation3 + $0x78] sm:$0xff]  ;;  %v234_v4 = vld [vmem:[#allocation3 + $0x70] sm:$0xff]  ;;  %v233_v7 = vld [vmem:[#allocation3 + $0x68] sm:$0xff]  ;;  %s194_s19 = sand.u32 1, %s1480_s13   ;;  %s1002_s27 = sshll.u32 %s1488_s15, 7 }
  0x27   : > { %s198_s8 = scalar_select %p197_p12, %s1488_s15, 1  ;;  %1107 = vmatprep.subr.mxu0 %v1502_v1  ;;  %1174 = vmatprep.mubr.msk.f32.mxu1 %vm1503_vm0, %v1502_v1  ;;  %v1613_v5 = vand.u32 4294901760, %v235_v3  ;;  %v1615_v6 = vand.u32 4294901760, %v234_v4  ;;  %v232_v8 = vld [vmem:[#allocation3 + $0x60] sm:$0xff]  ;;  %v231_v9 = vld [vmem:[#allocation3 + $0x58] sm:$0xff]  ;;  %v1617_v10 = vand.u32 4294901760, %v233_v7 }
  0x28   : > { %1139 = vmatprep.mubr.msk.f32.mxu0 %vm1503_vm0, %v1502_v1  ;;  %v1619_v11 = vand.u32 4294901760, %v232_v8  ;;  %v1621_v12 = vand.u32 4294901760, %v231_v9  ;;  %v230_v13 = vld [vmem:[#allocation3 + $0x50] sm:$0xff]  ;;  %v229_v14 = vld [vmem:[#allocation3 + $0x48] sm:$0xff]  ;;  %v228_v15 = vld [vmem:[#allocation3 + $0x40] sm:$0xff]  ;;  %s994_s21 = sshll.u32 %s194_s19, 3  ;;  %s904_s5 = scalar_lea.hbm %s2027_s3, %s1002_s27 }
  0x29   : > { %s995_s9 = sshll.u32 %s198_s8, 3  ;;  %v1624_v16 = vsub.f32 %v235_v3, %v1613_v5  ;;  %v1627_v17 = vsub.f32 %v234_v4, %v1615_v6  ;;  %1108 = vmatpush3.msra.mxu0 %v1613_v5  ;;  %v1630_v18 = vand.u32 4294901760, %v230_v13  ;;  %v1632_v19 = vand.u32 4294901760, %v229_v14  ;;  %v227_v36 = vld [vmem:[#allocation3 + $0x38] sm:$0xff]  ;;  %v226_v37 = vld [vmem:[#allocation3 + $0x30] sm:$0xff]  ;;  %v225_v41 = vld [vmem:[#allocation3 + $0x28] sm:$0xff] }
  0x2a   : > { %s200_s18 = scalar_lea.vmem %s2024_s0, %s995_s9  ;;  %v1635_v20 = vsub.f32 %v233_v7, %v1617_v10  ;;  %v1638_v21 = vsub.f32 %v232_v8, %v1619_v11  ;;  %v1641_v22 = vsub.f32 %v231_v9, %v1621_v12  ;;  %1109 = vmatprep.subr.mxu0 %v1502_v1  ;;  %v1644_v23 = vand.u32 4294901760, %v228_v15  ;;  %v224_v43 = vld [vmem:[#allocation3 + $0x20] sm:$0xff]  ;;  %v223_v51 = vld [vmem:[#allocation3 + $0x18] sm:$0xff]  ;;  %v222_v57 = vld [vmem:[#allocation3 + $0x10] sm:$0xff]  ;;  %s196_s28 = scalar_lea.vmem [#allocation6], %s994_s21 }
  0x2b   : > { %v207_v2 = vld [vmem:[%s200_s18] sm:$0xff]  ;;  %v330_v24 = vand.u32 4294901760, %v1624_v16  ;;  %v337_v25 = vand.u32 4294901760, %v1627_v17  ;;  %v1649_v26 = vsub.f32 %v230_v13, %v1630_v18  ;;  %1110 = vmatpush3.msra.mxu0 %v1615_v6  ;;  %v1656_v29 = vsub.f32 %v229_v14, %v1632_v19  ;;  %v221_v63 = vld [vmem:[#allocation3 + $0x8] sm:$0xff]  ;;  %s906_s29 = sshll.u32 %s196_s28, 4  ;;  %s893_s6 = scalar_lea.sflag [#allocation5], %s194_s19  ;;  %s907_s29 = int_to_ptr.vmem [resolvable:$true] %s906_s29 }
  0x2c   : > { %214 = vperm.xlu0 %1389, %v207_v2   ;;  %v344_v27 = vand.u32 4294901760, %v1635_v20  ;;  %v351_v28 = vand.u32 4294901760, %v1638_v21  ;;  %1111 = vmatprep.subr.mxu0 %v1502_v1  ;;  %v358_v32 = vand.u32 4294901760, %v1641_v22  ;;  %v1672_v35 = vsub.f32 %v228_v15, %v1644_v23  ;;  %v220_v8 = vld [vmem:[#allocation3] sm:$0xff]  ;;  %s1416_s7 = scalar_lea.vmem %s907_s29, 128  ;;  %s1505_s8 = smov [#allocation6]  }
  0x2d   : > { %v331_v30 = vsub.f32 %v1624_v16, %v330_v24  ;;  %v338_v31 = vsub.f32 %v1627_v17, %v337_v25  ;;  %1112 = vmatpush3.msra.mxu0 %v1617_v10  ;;  %v365_v34 = vand.u32 4294901760, %v1649_v26  ;;  %v372_v42 = vand.u32 4294901760, %v1656_v29  ;;  %p1417_p10 = scmp.ne.s32.totalorder %s907_s29, %s1416_s7  ;;  %s1420_s9 = sshll.u32 %s1505_s8, 4  ;;  %s1421_s9 = int_to_ptr.vmem [resolvable:$false] %s1420_s9 }
  0x2e   : > { %v345_v33 = vsub.f32 %v1635_v20, %v344_v27  ;;  %1113 = vmatprep.subr.mxu0 %v1502_v1  ;;  %v352_v40 = vsub.f32 %v1638_v21, %v351_v28  ;;  %v359_v45 = vsub.f32 %v1641_v22, %v358_v32  ;;  %v1683_v46 = vand.u32 4294901760, %v227_v36  ;;  %s1422_s15 = scalar_lea.vmem %s1421_s9, 256  ;;  %p1423_p0 = scmp.lt.s32.totalorder %s907_s29, %s1421_s9 }
  0x2f   : > { %v332_v38 = vand.u32 4294901760, %v331_v30  ;;  %v339_v39 = vand.u32 4294901760, %v338_v31  ;;  %1114 = vmatpush3.msra.mxu0 %v1619_v11  ;;  %v1686_v47 = vand.u32 4294901760, %v226_v37  ;;  %v366_v48 = vsub.f32 %v1649_v26, %v365_v34  ;;  %p1418_p11 = pnand %p1417_p10, %p1566_p4  ;;  %p1424_p1 = scmp.lt.s32.totalorder %s1422_s15, %s1416_s7 }
  0x30   : > { %1115 = vmatprep.subr.mxu0 %v1502_v1  ;;  %v346_v44 = vand.u32 4294901760, %v345_v33  ;;  %v379_v49 = vand.u32 4294901760, %v1672_v35  ;;  %v1694_v50 = vand.u32 4294901760, %v225_v41  ;;  %v353_v52 = vand.u32 4294901760, %v352_v40 }
  0x31   : > { %1143 = vmatpush3.msra.mxu1 %v332_v38  ;;  %1116 = vmatpush3.msra.mxu0 %v1621_v12  ;;  %v1697_v53 = vsub.f32 %v227_v36, %v1683_v46  ;;  %v1700_v54 = vsub.f32 %v226_v37, %v1686_v47  ;;  %v1703_v55 = vand.u32 4294901760, %v224_v43  ;;  %v373_v56 = vsub.f32 %v1656_v29, %v372_v42  ;;  %p1419_p13 = pneg %p1418_p11  ;;  %p1425_p2 = por %p1424_p1, %p1423_p0 }
  0x32   : > { %1144 = vmatprep.subr.mxu1 %v1502_v1  ;;  %1117 = vmatprep.subr.mxu0 %v1502_v1  ;;  %v360_v58 = vand.u32 4294901760, %v359_v45  ;;  %v1712_v60 = vsub.f32 %v225_v41, %v1694_v50  ;;  %v1715_v61 = vand.u32 4294901760, %v223_v51  ;;  %v380_v62 = vsub.f32 %v1672_v35, %v379_v49 }
  0x33   : > { %1145 = vmatpush3.msra.mxu1 %v339_v39  ;;  %1118 = vmatpush3.msra.mxu0 %v1630_v18  ;;  %v386_v59 = vand.u32 4294901760, %v1697_v53  ;;  %v367_v0 = vand.u32 4294901760, %v366_v48  ;;  %v393_v2 = vand.u32 4294901760, %v1700_v54  ;;  %v1724_v3 = vsub.f32 %v224_v43, %v1703_v55  ;;  %p1426_p3 = pnand %p1425_p2, %p1419_p13 }
  0x34   : > { %1146 = vmatprep.subr.mxu1 %v1502_v1  ;;  %1119 = vmatprep.subr.mxu0 %v1502_v1  ;;  %v1727_v4 = vand.u32 4294901760, %v222_v57  ;;  %v374_v7 = vand.u32 4294901760, %v373_v56  ;;  %v400_v13 = vand.u32 4294901760, %v1712_v60  ;;  %v1736_v14 = vsub.f32 %v223_v51, %v1715_v61 }
  0x35   : > { %1147 = vmatpush3.msra.mxu1 %v346_v44  ;;  %1120 = vmatpush3.msra.mxu0 %v1632_v19  ;;  %v387_v9 = vsub.f32 %v1697_v53, %v386_v59  ;;  %v1739_v15 = vand.u32 4294901760, %v221_v63  ;;  %v381_v30 = vand.u32 4294901760, %v380_v62  ;;  %v394_v31 = vsub.f32 %v1700_v54, %v393_v2 }
  0x36   : > { %1148 = vmatprep.subr.mxu1 %v1502_v1  ;;  %1121 = vmatprep.subr.mxu0 %v1502_v1  ;;  %v407_v33 = vand.u32 4294901760, %v1724_v3  ;;  %v1748_v36 = vsub.f32 %v222_v57, %v1727_v4  ;;  %v1751_v37 = vand.u32 4294901760, %v220_v8  ;;  %v401_v39 = vsub.f32 %v1712_v60, %v400_v13 }
  0x37   : > { %1149 = vmatpush3.msra.mxu1 %v353_v52  ;;  %1122 = vmatpush3.msra.mxu0 %v1644_v23  ;;  %v388_v38 = vand.u32 4294901760, %v387_v9  ;;  %v414_v40 = vand.u32 4294901760, %v1736_v14  ;;  %v1760_v41 = vsub.f32 %v221_v63, %v1739_v15  ;;  %v395_v43 = vand.u32 4294901760, %v394_v31 }
  0x38   : > { %1150 = vmatprep.subr.mxu1 %v1502_v1  ;;  %1123 = vmatprep.subr.mxu0 %v1502_v1  ;;  %v408_v44 = vsub.f32 %v1724_v3, %v407_v33  ;;  %v421_v45 = vand.u32 4294901760, %v1748_v36  ;;  %v1770_v48 = vsub.f32 %v220_v8, %v1751_v37  ;;  %v402_v51 = vand.u32 4294901760, %v401_v39 }
  0x39   : > { %1151 = vmatpush3.msra.mxu1 %v360_v58  ;;  %1124 = vmatpush3.msra.mxu0 %v1683_v46  ;;  %v415_v52 = vsub.f32 %v1736_v14, %v414_v40  ;;  %v428_v56 = vand.u32 4294901760, %v1760_v41  ;;  %v208_v31 = vlaneseq }
  0x3a   : > { %1152 = vmatprep.subr.mxu1 %v1502_v1  ;;  %1125 = vmatprep.subr.mxu0 %v1502_v1  ;;  %v409_v57 = vand.u32 4294901760, %v408_v44  ;;  %v422_v58 = vsub.f32 %v1748_v36, %v421_v45  ;;  %v435_v62 = vand.u32 4294901760, %v1770_v48  ;;  %v1504_v44 = vmov 1.0  }
  0x3b   : > { %1153 = vmatpush3.msra.mxu1 %v367_v0  ;;  %1126 = vmatpush3.msra.mxu0 %v1686_v47  ;;  %v416_v63 = vand.u32 4294901760, %v415_v52  ;;  %v429_v0 = vsub.f32 %v1760_v41, %v428_v56 }
  0x3c   : > { %1154 = vmatprep.subr.mxu1 %v1502_v1  ;;  %1127 = vmatprep.subr.mxu0 %v1502_v1  ;;  %v436_v8 = vsub.f32 %v1770_v48, %v435_v62 }
  0x3d   : > { %1155 = vmatpush3.msra.mxu1 %v374_v7  ;;  %1128 = vmatpush3.msra.mxu0 %v1694_v50  ;;  %v423_v7 = vand.u32 4294901760, %v422_v58  ;;  %v430_v9 = vand.u32 4294901760, %v429_v0 }
  0x3e   : > { %1156 = vmatprep.subr.mxu1 %v1502_v1  ;;  %1129 = vmatprep.subr.mxu0 %v1502_v1 }
  0x3f   : > { %1157 = vmatpush3.msra.mxu1 %v381_v30  ;;  %1130 = vmatpush3.msra.mxu0 %v1703_v55  ;;  %v437_v30 = vand.u32 4294901760, %v436_v8 }
  0x40   : > { %1158 = vmatprep.subr.mxu1 %v1502_v1  ;;  %1131 = vmatprep.subr.mxu0 %v1502_v1 }
  0x41   : > { %1159 = vmatpush3.msra.mxu1 %v388_v38  ;;  %1132 = vmatpush3.msra.mxu0 %v1715_v61  ;;  %v1805_v38 = vand.u32 127, %v208_v31 }
  0x42   : > { %1160 = vmatprep.subr.mxu1 %v1502_v1  ;;  %1133 = vmatprep.subr.mxu0 %v1502_v1 }
  0x43   : > { %1161 = vmatpush3.msra.mxu1 %v395_v43  ;;  %1134 = vmatpush3.msra.mxu0 %v1727_v4 }
  0x44   : > { %1162 = vmatprep.subr.mxu1 %v1502_v1  ;;  %1135 = vmatprep.subr.mxu0 %v1502_v1 }
  0x45   : > { %1163 = vmatpush3.msra.mxu1 %v402_v51  ;;  %1136 = vmatpush3.msra.mxu0 %v1739_v15 }
  0x46   : > { %1164 = vmatprep.subr.mxu1 %v1502_v1  ;;  %1137 = vmatprep.subr.mxu0 %v1502_v1 }
  0x47   : > { %1165 = vmatpush3.msra.mxu1 %v409_v57  ;;  %1138 = vmatpush3.msra.mxu0 %v1751_v37 }
  0x48   : > { %1166 = vmatprep.subr.mxu1 %v1502_v1  ;;  %1177 = vmatprep.subr.mxu0 %v1502_v1 }
  0x49   : > { %1167 = vmatpush3.msra.mxu1 %v416_v63 }
  0x4a   : > { %1168 = vmatprep.subr.mxu1 %v1502_v1 }
  0x4b   : > { %1169 = vmatpush3.msra.mxu1 %v423_v7 }
  0x4c   : > { %1170 = vmatprep.subr.mxu1 %v1502_v1 }
  0x4d   : > { %1171 = vmatpush3.msra.mxu1 %v430_v9 }
  0x4e   : > { %1172 = vmatprep.subr.mxu1 %v1502_v1 }
  0x4f   : > { %1173 = vmatpush3.msra.mxu1 %v437_v30 }
  0x50   : > { %1212 = vmatprep.subr.mxu1 %v1502_v1 }
  0xa7   : > { %v1807_v39 = vpop.permute.xlu0 %214 }
  0xa8   : > { %vm216_vm1 = vcmp.eq.s32.totalorder %v1805_v38, %v1807_v39 }
  0xa9   : > { %v996_v43 = vsel %vm216_vm1, 1.0, %v1502_v1  ;;  %1175 = vmatmul.mubr.msk.f32.vlgmr.msra.gmra.mxu1 %vm216_vm1, %v1504_v44 }
  0xaa   : > { %v1819_v51 = vsub.f32 %v996_v43, %v996_v43  ;;  %1213 = vmatpush3.msra.mxu1 %v1613_v5  ;;  %1244 = vmatprep.mubr.msk.f32.mxu1 %vm1503_vm0, %v1502_v1 }
  0xab   : > { %1214 = vmatprep.subr.mxu1 %v1502_v1 }
  0xac   : > { %1215 = vmatpush3.msra.mxu1 %v1615_v6  ;;  %v319_v52 = vand.u32 4294901760, %v1819_v51 }
  0xad   : > { %1216 = vmatprep.subr.mxu1 %v1502_v1 }
  0xae   : > { %1217 = vmatpush3.msra.mxu1 %v1617_v10  ;;  %v320_v57 = vsub.f32 %v1819_v51, %v319_v52 }
  0xaf   : > { %1218 = vmatprep.subr.mxu1 %v1502_v1 }
  0xb0   : > { %1219 = vmatpush3.msra.mxu1 %v1619_v11  ;;  %v321_v58 = vand.u32 4294901760, %v320_v57 }
  0xb1   : > { %1220 = vmatprep.subr.mxu1 %v1502_v1 }
  0xb2   : > { %1221 = vmatpush3.msra.mxu1 %v1621_v12  ;;  %1140 = vmatmul.mubr.f32.vlgmr.msra.gmra.mxu0 %v321_v58 }
  0xb3   : > { %1178 = vmatpush3.msra.mxu0 %v1624_v16  ;;  %1222 = vmatprep.subr.mxu1 %v1502_v1 }
  0xb4   : > { %1179 = vmatprep.subr.mxu0 %v1502_v1  ;;  %1223 = vmatpush3.msra.mxu1 %v1630_v18 }
  0xb5   : > { %1180 = vmatpush3.msra.mxu0 %v1627_v17  ;;  %1224 = vmatprep.subr.mxu1 %v1502_v1 }
  0xb6   : > { %1181 = vmatprep.subr.mxu0 %v1502_v1  ;;  %1225 = vmatpush3.msra.mxu1 %v1632_v19 }
  0xb7   : > { %1182 = vmatpush3.msra.mxu0 %v1635_v20  ;;  %1226 = vmatprep.subr.mxu1 %v1502_v1 }
  0xb8   : > { %1183 = vmatprep.subr.mxu0 %v1502_v1  ;;  %1227 = vmatpush3.msra.mxu1 %v1644_v23 }
  0xb9   : > { %1184 = vmatpush3.msra.mxu0 %v1638_v21  ;;  %1228 = vmatprep.subr.mxu1 %v1502_v1 }
  0xba   : > { %1185 = vmatprep.subr.mxu0 %v1502_v1  ;;  %1229 = vmatpush3.msra.mxu1 %v1683_v46 }
  0xbb   : > { %1186 = vmatpush3.msra.mxu0 %v1641_v22  ;;  %1230 = vmatprep.subr.mxu1 %v1502_v1 }
  0xbc   : > { %1187 = vmatprep.subr.mxu0 %v1502_v1  ;;  %1231 = vmatpush3.msra.mxu1 %v1686_v47 }
  0xbd   : > { %1188 = vmatpush3.msra.mxu0 %v1649_v26  ;;  %1232 = vmatprep.subr.mxu1 %v1502_v1 }
  0xbe   : > { %1189 = vmatprep.subr.mxu0 %v1502_v1  ;;  %1233 = vmatpush3.msra.mxu1 %v1694_v50 }
  0xbf   : > { %1190 = vmatpush3.msra.mxu0 %v1656_v29  ;;  %1234 = vmatprep.subr.mxu1 %v1502_v1 }
  0xc0   : > { %1191 = vmatprep.subr.mxu0 %v1502_v1  ;;  %1235 = vmatpush3.msra.mxu1 %v1703_v55 }
  0xc1   : > { %1192 = vmatpush3.msra.mxu0 %v1672_v35  ;;  %1236 = vmatprep.subr.mxu1 %v1502_v1 }
  0xc2   : > { %1193 = vmatprep.subr.mxu0 %v1502_v1  ;;  %1237 = vmatpush3.msra.mxu1 %v1715_v61 }
  0xc3   : > { %1194 = vmatpush3.msra.mxu0 %v1697_v53  ;;  %1238 = vmatprep.subr.mxu1 %v1502_v1 }
  0xc4   : > { %1195 = vmatprep.subr.mxu0 %v1502_v1  ;;  %1239 = vmatpush3.msra.mxu1 %v1727_v4 }
  0xc5   : > { %1196 = vmatpush3.msra.mxu0 %v1700_v54  ;;  %1240 = vmatprep.subr.mxu1 %v1502_v1 }
  0xc6   : > { %1197 = vmatprep.subr.mxu0 %v1502_v1  ;;  %1241 = vmatpush3.msra.mxu1 %v1739_v15 }
  0xc7   : > { %1198 = vmatpush3.msra.mxu0 %v1712_v60  ;;  %1242 = vmatprep.subr.mxu1 %v1502_v1 }
  0xc8   : > { %1199 = vmatprep.subr.mxu0 %v1502_v1  ;;  %1243 = vmatpush3.msra.mxu1 %v1751_v37 }
  0xc9   : > { %1200 = vmatpush3.msra.mxu0 %v1724_v3  ;;  %1245 = vmatmul.mubr.f32.vlgmr.msra.gmra.mxu1 %v319_v52 }
  0xca   : > { %1282 = vmatprep.subr.mxu1 %v1502_v1  ;;  %1201 = vmatprep.subr.mxu0 %v1502_v1 }
  0xcb   : > { %1283 = vmatpush3.msra.mxu1 %v1613_v5  ;;  %1202 = vmatpush3.msra.mxu0 %v1736_v14 }
  0xcc   : > { %1284 = vmatprep.subr.mxu1 %v1502_v1  ;;  %1203 = vmatprep.subr.mxu0 %v1502_v1 }
  0xcd   : > { %1285 = vmatpush3.msra.mxu1 %v1615_v6  ;;  %1204 = vmatpush3.msra.mxu0 %v1748_v36 }
  0xce   : > { %1286 = vmatprep.subr.mxu1 %v1502_v1  ;;  %1205 = vmatprep.subr.mxu0 %v1502_v1 }
  0xcf   : > { %1287 = vmatpush3.msra.mxu1 %v1617_v10  ;;  %1206 = vmatpush3.msra.mxu0 %v1760_v41 }
  0xd0   : > { %1288 = vmatprep.subr.mxu1 %v1502_v1  ;;  %1207 = vmatprep.subr.mxu0 %v1502_v1 }
  0xd1   : > { %1289 = vmatpush3.msra.mxu1 %v1619_v11  ;;  %1208 = vmatpush3.msra.mxu0 %v1770_v48 }
  0xd2   : > { %1209 = vmatprep.mubr.msk.f32.mxu0 %vm1503_vm0, %v1502_v1  ;;  %1290 = vmatprep.subr.mxu1 %v1502_v1 }
  0xd3   : > { %1210 = vmatmul.mubr.f32.vlgmr.msra.gmra.mxu0 %v1819_v51  ;;  %1247 = vmatprep.subr.mxu0 %v1502_v1 }
  0xd4   : > { %1291 = vmatpush3.msra.mxu1 %v1621_v12  ;;  %1248 = vmatpush3.msra.mxu0 %v330_v24 }
  0xd5   : > { %1292 = vmatprep.subr.mxu1 %v1502_v1  ;;  %1249 = vmatprep.subr.mxu0 %v1502_v1 }
  0xd6   : > { %1293 = vmatpush3.msra.mxu1 %v1630_v18  ;;  %1250 = vmatpush3.msra.mxu0 %v337_v25  ;;  %v1000_v25 = vld [vmem:[%s2026_s2] ss:$0 sm:$0xff] }
  0xd7   : > { %1294 = vmatprep.subr.mxu1 %v1502_v1  ;;  %1251 = vmatprep.subr.mxu0 %v1502_v1 }
  0xd8   : > { %1295 = vmatpush3.msra.mxu1 %v1632_v19  ;;  %1252 = vmatpush3.msra.mxu0 %v344_v27 }
  0xd9   : > { %1296 = vmatprep.subr.mxu1 %v1502_v1  ;;  %1253 = vmatprep.subr.mxu0 %v1502_v1 }
  0xda   : > { %1297 = vmatpush3.msra.mxu1 %v1644_v23  ;;  %1254 = vmatpush3.msra.mxu0 %v351_v28 }
  0xdb   : > { %1298 = vmatprep.subr.mxu1 %v1502_v1  ;;  %1255 = vmatprep.subr.mxu0 %v1502_v1 }
  0xdc   : > { %1299 = vmatpush3.msra.mxu1 %v1683_v46  ;;  %1256 = vmatpush3.msra.mxu0 %v358_v32 }
  0xdd   : > { %1300 = vmatprep.subr.mxu1 %v1502_v1  ;;  %1257 = vmatprep.subr.mxu0 %v1502_v1 }
  0xde   : > { %1301 = vmatpush3.msra.mxu1 %v1686_v47  ;;  %1258 = vmatpush3.msra.mxu0 %v365_v34 }
  0xdf   : > { %1302 = vmatprep.subr.mxu1 %v1502_v1  ;;  %1259 = vmatprep.subr.mxu0 %v1502_v1 }
  0xe0   : > { %1303 = vmatpush3.msra.mxu1 %v1694_v50  ;;  %1260 = vmatpush3.msra.mxu0 %v372_v42 }
  0xe1   : > { %1304 = vmatprep.subr.mxu1 %v1502_v1  ;;  %1261 = vmatprep.subr.mxu0 %v1502_v1 }
  0xe2   : > { %1305 = vmatpush3.msra.mxu1 %v1703_v55  ;;  %1262 = vmatpush3.msra.mxu0 %v379_v49 }
  0xe3   : > { %1306 = vmatprep.subr.mxu1 %v1502_v1  ;;  %1263 = vmatprep.subr.mxu0 %v1502_v1 }
  0xe4   : > { %1307 = vmatpush3.msra.mxu1 %v1715_v61  ;;  %1264 = vmatpush3.msra.mxu0 %v386_v59 }
  0xe5   : > { %1308 = vmatprep.subr.mxu1 %v1502_v1  ;;  %1265 = vmatprep.subr.mxu0 %v1502_v1 }
  0xe6   : > { %1309 = vmatpush3.msra.mxu1 %v1727_v4  ;;  %1266 = vmatpush3.msra.mxu0 %v393_v2 }
  0xe7   : > { %1310 = vmatprep.subr.mxu1 %v1502_v1  ;;  %1267 = vmatprep.subr.mxu0 %v1502_v1 }
  0xe8   : > { %1311 = vmatpush3.msra.mxu1 %v1739_v15  ;;  %1268 = vmatpush3.msra.mxu0 %v400_v13 }
  0xe9   : > { %1312 = vmatprep.subr.mxu1 %v1502_v1  ;;  %1269 = vmatprep.subr.mxu0 %v1502_v1 }
  0xea   : > { %1313 = vmatpush3.msra.mxu1 %v1751_v37  ;;  %1314 = vmatprep.mubr.msk.f32.mxu1 %vm1503_vm0, %v1502_v1 }
  0xeb   : > { %1270 = vmatpush3.msra.mxu0 %v407_v33  ;;  %1315 = vmatmul.mubr.msk.f32.vlgmr.msra.gmra.mxu1 %vm216_vm1, %v1504_v44 }
  0xec   : > { %1271 = vmatprep.subr.mxu0 %v1502_v1  ;;  %1279 = vmatprep.mubr.msk.f32.mxu0 %vm1503_vm0, %v1502_v1 }
  0xed   : > { %1272 = vmatpush3.msra.mxu0 %v414_v40 }
  0xee   : > { %1273 = vmatprep.subr.mxu0 %v1502_v1 }
  0xef   : > { %1274 = vmatpush3.msra.mxu0 %v421_v45 }
  0xf0   : > { %1275 = vmatprep.subr.mxu0 %v1502_v1 }
  0xf1   : > { %1276 = vmatpush3.msra.mxu0 %v428_v56 }
  0xf2   : > { %1277 = vmatprep.subr.mxu0 %v1502_v1 }
  0xf3   : > { %1278 = vmatpush3.msra.mxu0 %v435_v62 }
  0xf4   : > { %1280 = vmatmul.mubr.msk.f32.vlgmr.msra.gmra.mxu0 %vm216_vm1, %v1504_v44 }
 0x169   : > { %v474_v5 = vpop.f32.mrf.mxu1 }
 0x16b   : > { %v1176_v6 = vpop.f32.mrf.mxu1 }
 0x172   : > { %v323_v10 = vpop.f32.mrf.mxu0 }
 0x173   : > { %v475_v20 = vadd.f32 %v474_v5, %v323_v10 }
 0x174   : > { %v1141_v11 = vpop.f32.mrf.mxu0 }
 0x189   : > { %v667_v12 = vpop.f32.mrf.mxu1 }
 0x18b   : > { %v1246_v16 = vpop.f32.mrf.mxu1 }
 0x193   : > { %v578_v17 = vpop.f32.mrf.mxu0 }
 0x194   : > { %v579_v21 = vadd.f32 %v578_v17, %v475_v20 }
 0x195   : > { %v1211_v18 = vpop.f32.mrf.mxu0 }
 0x196   : > { %v668_v22 = vadd.f32 %v667_v12, %v579_v21 }
 0x1ab   : > { %v873_v19 = vpop.f32.mrf.mxu1 }
 0x1ad   : > { %v1316_v1 = vpop.f32.mrf.mxu1 }
 0x1b4   : > { %v786_v23 = vpop.f32.mrf.mxu0 }
 0x1b5   : > { %v787_v24 = vadd.f32 %v786_v23, %v668_v22 }
 0x1b6   : > { %v1281_v26 = vpop.f32.mrf.mxu0 }
 0x1b7   : > { %v874_v27 = vadd.f32 %v873_v19, %v787_v24 }
 0x1b9   : > { %v890_v28 = vadd.f32 %v1000_v25, %v874_v27 }
 0x1bb   : > { %891 = vst [vmem:[%s196_s28] sm:$0xff] %v890_v28 }
 0x1bc   : > { %1429 = shalt.err (!%p1426_p3)
}
 0x1bd   : > { %s1430_s10 = scalar_lea.hbm %s904_s5, 128  ;;  %s1434_s19 = scalar_lea.hbm %s2027_s3, 256 }
 0x1be   : > { %p1431_p5 = scmp.ne.s32.totalorder %s904_s5, %s1430_s10  ;;  %p1435_p9 = scmp.lt.s32.totalorder %s904_s5, %s2027_s3 }
 0x1bf   : > { %p1436_p12 = scmp.lt.s32.totalorder %s1434_s19, %s1430_s10 }
 0x1c0   : > { %p1432_p6 = pnand %p1431_p5, %p1566_p4 }
 0x1c1   : > { %p1437_p10 = por %p1436_p12, %p1435_p9 }
 0x1c2   : > { %p1433_p7 = pneg %p1432_p6 }
 0x1c4   : > { %p1438_p11 = pnand %p1437_p10, %p1433_p7 }
 0x1c6   : > { %1441 = shalt.err (!%p1438_p11)
}
 0x1c7   : > { %1321 = dma.vmem_to_hbm [thread:$0]  (%p1566_p4), %s907_s29, 128, %s904_s5, %s893_s6  }
 0x1c8 PF: > { %p1333_p13 = scmp.ge.s32.totalorder %s1496_s17, 2  ;;  %s918_s26 = sand.u32 1, %s1476_s12  }
 0x1c9   : > { %s919_s27 = scalar_lea.sflag [#allocation5], %s918_s26 }
 0x1ca   : > { %p1328_p0 = pnand %p1333_p13, %p1573_p8 }
 0x1cc   : > { %p1329_p1 = pneg %p1328_p0 }
 0x1ce   : > { %1471 = dma.done.wait (%p1329_p1), %s919_s27, 128  }
 0x1cf   : > { %1473 = vsyncadd (%p1329_p1), %s919_s27, 4294967168  ;;  %s17_s17 = sadd.s32 1, %s1496_s17   ;;  %s2032_s12 = smov %s1480_s13 }
 0x1d0   : > { %p14_p2 = scmp.ge.s32.totalorder %s17_s17, 4   ;;  %s2033_s13 = smov %s1484_s14 }
 0x1d1   : > { %s2034_s14 = smov %s1579_s25  ;;  %s2035_s15 = smov %s1492_s16 }
 0x1d2   : > { %s2036_s16 = smov %s2038_s20  ;;  %16 = sbr.rel (!%p14_p2) target bundleno = 5 (0x5), region = 81 }
 0x1d7   :  { %924 = vsyncpa [#allocation4], 1 }
 0x1d8   :  { %926 = vsyncpa [#allocation4 + $0x1], 1 }
 0x1d9   :  { %927 = vsyncpa [#allocation5], 1 }
 0x1da   :  { %929 = vsyncpa [#allocation5 + $0x1], 1 }

</bundles_post_ra>
